<compile_context>
chip_gen: v5e
topology: v5e:2x2
jax: 0.10.0
libtpu: 0.0.40
codegen_flags: <defaults>
</compile_context>

<pallas_src>
import functools
import math

import jax
import jax.numpy as jnp
from jax import lax
from jax.experimental import pallas as pl
from jax.experimental.pallas import tpu as pltpu

_EPS = 1e-7
_LOG_EPS = math.log(_EPS)                  # log(1e-7)  (off-target one-hot entries)
_LOG_1P_EPS = math.log(1.0 + _EPS)         # log(1+1e-7) (target entry)
_LANE_MAJOR_MAX_C = 128                    # below this, use the lane-major layout


def _round_up(x, m):
    return ((x + m - 1) // m) * m


def _choose_tile(n, c, *, align, max_tile, tile_bytes=2 * 1024 * 1024):
    """Largest tile (multiple of `align`) within a conservative VMEM budget."""
    t = tile_bytes // max(1, c * 4)
    t = min(t, max_tile, _round_up(n, align))
    t = max(align, (t // align) * align)
    return t


# ---------------------------------------------------------------------------
# Lane-major kernel: logits (C, TN)  -- classes on sublanes, samples on lanes.
# ---------------------------------------------------------------------------
def _wsce_lane_major_kernel(logits_ref, tgt_ref, w_ref, out_ref, *,
                            alpha, beta, total_n, tile_n):
    i = pl.program_id(0)

    logits = logits_ref[...].astype(jnp.float32)          # (C, TN)
    tgt = tgt_ref[...]                                     # (1, TN) int32
    w = w_ref[...]                                         # (C, 1)  f32

    # Numerically stable softmax over classes (sublane axis), then the clamp
    # exactly as in the reference.
    m = jnp.max(logits, axis=0, keepdims=True)             # (1, TN)
    e = jnp.exp(logits - m)                                 # (C, TN)
    s = jnp.sum(e, axis=0, keepdims=True)                   # (1, TN)
    p = jnp.clip(e / s, _EPS, 1.0)                           # (C, TN)

    cls = lax.broadcasted_iota(jnp.int32, logits.shape, 0)  # (C, TN)
    onehot = cls == tgt                                      # (C, TN) bool

    p_t = jnp.sum(jnp.where(onehot, p, 0.0), axis=0, keepdims=True)     # (1, TN)
    sum_p = jnp.sum(p, axis=0, keepdims=True)                            # (1, TN)

    ce = -jnp.log(p_t)                                                   # (1, TN)
    # rce = -sum_j p_j * log(one_hot_j + eps)
    #     = -(p_t*log(1+eps) + (sum_p - p_t)*log(eps))
    rce = -(p_t * _LOG_1P_EPS + (sum_p - p_t) * _LOG_EPS)                # (1, TN)

    w_row = jnp.sum(jnp.where(onehot, w, 0.0), axis=0, keepdims=True)    # (1, TN)

    combined = w_row * (alpha * ce + beta * rce)                         # (1, TN)

    # Zero out padded samples (global column index >= total_n).
    col = lax.broadcasted_iota(jnp.int32, combined.shape, 1) + i * tile_n
    out_ref[...] = jnp.where(col < total_n, combined, 0.0)


# ---------------------------------------------------------------------------
# Row-major kernel: logits (TN, C) -- samples on sublanes, classes on lanes.
# ---------------------------------------------------------------------------
def _wsce_row_major_kernel(logits_ref, tgt_ref, w_ref, out_ref, *,
                           alpha, beta, total_n, tile_n):
    i = pl.program_id(0)

    logits = logits_ref[...].astype(jnp.float32)           # (TN, C)
    tgt = tgt_ref[...]                                      # (TN, 1) int32
    w = w_ref[...]                                          # (1, C)  f32

    m = jnp.max(logits, axis=-1, keepdims=True)              # (TN, 1)
    e = jnp.exp(logits - m)                                   # (TN, C)
    s = jnp.sum(e, axis=-1, keepdims=True)                    # (TN, 1)
    p = jnp.clip(e / s, _EPS, 1.0)                             # (TN, C)

    cls = lax.broadcasted_iota(jnp.int32, logits.shape, 1)    # (TN, C)
    onehot = cls == tgt                                        # (TN, C) bool

    p_t = jnp.sum(jnp.where(onehot, p, 0.0), axis=-1, keepdims=True)    # (TN, 1)
    sum_p = jnp.sum(p, axis=-1, keepdims=True)                           # (TN, 1)

    ce = -jnp.log(p_t)
    rce = -(p_t * _LOG_1P_EPS + (sum_p - p_t) * _LOG_EPS)

    w_row = jnp.sum(jnp.where(onehot, w, 0.0), axis=-1, keepdims=True)   # (TN, 1)

    combined = w_row * (alpha * ce + beta * rce)                          # (TN, 1)

    row = lax.broadcasted_iota(jnp.int32, combined.shape, 0) + i * tile_n
    out_ref[...] = jnp.where(row < total_n, combined, 0.0)


# ---------------------------------------------------------------------------
# Wrapper
# ---------------------------------------------------------------------------
def weighted_symmetric_cross_entropy(pred, labels, *, alpha=0.1, beta=1.0,
                                     num_classes=None, class_weights=None,
                                     tile_n=None):
    """pred: (N, C) float; labels: (N,) int. Returns scalar f32 loss."""
    n, c = pred.shape
    if num_classes is None:
        num_classes = c
    assert num_classes == c, "logits width must equal num_classes"

    logits = pred.astype(jnp.float32)
    labels_i32 = labels.astype(jnp.int32)

    compiler_params = pltpu.CompilerParams(
        dimension_semantics=("parallel",),
        vmem_limit_bytes=32 * 1024 * 1024,
    )

    lane_major = c < _LANE_MAJOR_MAX_C

    if lane_major:
        if tile_n is None:
            tile_n = _choose_tile(n, c, align=128, max_tile=256 * 1024)
        else:
            tile_n = _round_up(tile_n, 128)
        n_pad = _round_up(n, tile_n)

        logits_t = logits.T                                  # (C, N)
        if n_pad != n:
            logits_t = jnp.pad(logits_t, ((0, 0), (0, n_pad - n)))
            labels_i32 = jnp.pad(labels_i32, (0, n_pad - n))
        tgt2d = labels_i32.reshape(1, n_pad)

        if class_weights is None:
            w2d = jnp.ones((c, 1), jnp.float32)
        else:
            w2d = jnp.asarray(class_weights, jnp.float32).reshape(c, 1)

        num_tiles = n_pad // tile_n
        kernel = functools.partial(_wsce_lane_major_kernel, alpha=float(alpha),
                                   beta=float(beta), total_n=n, tile_n=tile_n)

        per_sample = pl.pallas_call(
            kernel,
            out_shape=jax.ShapeDtypeStruct((1, n_pad), jnp.float32),
            grid_spec=pltpu.PrefetchScalarGridSpec(
                num_scalar_prefetch=0,
                grid=(num_tiles,),
                in_specs=[
                    pl.BlockSpec((c, tile_n), lambda i: (0, i)),
                    pl.BlockSpec((1, tile_n), lambda i: (0, i)),
                    pl.BlockSpec((c, 1), lambda i: (0, 0)),
                ],
                out_specs=pl.BlockSpec((1, tile_n), lambda i: (0, i)),
            ),
            compiler_params=compiler_params,
        )(logits_t, tgt2d, w2d)
    else:
        if tile_n is None:
            tile_n = _choose_tile(n, c, align=8, max_tile=2048)
        else:
            tile_n = _round_up(tile_n, 8)
        n_pad = _round_up(n, tile_n)

        if n_pad != n:
            logits = jnp.pad(logits, ((0, n_pad - n), (0, 0)))
            labels_i32 = jnp.pad(labels_i32, (0, n_pad - n))
        tgt2d = labels_i32.reshape(n_pad, 1)

        if class_weights is None:
            w2d = jnp.ones((1, c), jnp.float32)
        else:
            w2d = jnp.asarray(class_weights, jnp.float32).reshape(1, c)

        num_tiles = n_pad // tile_n
        kernel = functools.partial(_wsce_row_major_kernel, alpha=float(alpha),
                                   beta=float(beta), total_n=n, tile_n=tile_n)

        per_sample = pl.pallas_call(
            kernel,
            out_shape=jax.ShapeDtypeStruct((n_pad, 1), jnp.float32),
            grid_spec=pltpu.PrefetchScalarGridSpec(
                num_scalar_prefetch=0,
                grid=(num_tiles,),
                in_specs=[
                    pl.BlockSpec((tile_n, c), lambda i: (i, 0)),
                    pl.BlockSpec((tile_n, 1), lambda i: (i, 0)),
                    pl.BlockSpec((1, c), lambda i: (0, 0)),
                ],
                out_specs=pl.BlockSpec((tile_n, 1), lambda i: (i, 0)),
            ),
            compiler_params=compiler_params,
        )(logits, tgt2d, w2d)

    # Final mean in the wrapper (per-sample values already carry
    # alpha/beta/class weights; padded entries are zero).
    return jnp.sum(per_sample) / jnp.float32(n)


# ---------------------------------------------------------------------------
# Pure-JAX reference for verification.
# ---------------------------------------------------------------------------
def _wsce_ref(pred, labels, alpha, beta, num_classes, class_weights=None):
    p = jax.nn.softmax(pred, axis=1)
    p = jnp.clip(p, _EPS, 1.0)
    oh = jax.nn.one_hot(labels, num_classes, dtype=jnp.float32)
    ce = -jnp.sum(oh * jnp.log(p), axis=1)
    rce = -jnp.sum(p * jnp.log(oh + _EPS), axis=1)
    if class_weights is not None:
        w = jnp.asarray(class_weights, jnp.float32)[labels]
        ce = ce * w
        rce = rce * w
    return alpha * jnp.mean(ce) + beta * jnp.mean(rce)


if __name__ == "__main__":
    key = jax.random.PRNGKey(0)
    k1, k2 = jax.random.split(key)

    alpha, beta = 0.1, 1.0

    # 1) Module defaults: binary classification (C=2), with class weights.
    N, C = 16, 2
    pred = jax.random.normal(k1, (N, C), dtype=jnp.float32)
    labels = jax.random.randint(k2, (N,), 0, C, dtype=jnp.int32)
    class_weights = jnp.array([0.3, 0.7], dtype=jnp.float32)
    out = weighted_symmetric_cross_entropy(
        pred, labels, alpha=alpha, beta=beta,
        num_classes=C, class_weights=class_weights)
    out = jax.block_until_ready(out)
    ref = _wsce_ref(pred, labels, alpha, beta, C, class_weights)
    assert jnp.allclose(out, ref, atol=1e-5, rtol=1e-5), (out, ref)

    # 2) No class weights, N not a multiple of the tile (exercises padding /
    #    column masking in the lane-major path) and a different class count.
    N2, C2 = 13, 5
    k3, k4 = jax.random.split(k1)
    pred2 = jax.random.normal(k3, (N2, C2), dtype=jnp.float32)
    labels2 = jax.random.randint(k4, (N2,), 0, C2, dtype=jnp.int32)
    out2 = weighted_symmetric_cross_entropy(
        pred2, labels2, alpha=alpha, beta=beta, num_classes=C2)
    out2 = jax.block_until_ready(out2)
    ref2 = _wsce_ref(pred2, labels2, alpha, beta, C2, None)
    assert jnp.allclose(out2, ref2, atol=1e-5, rtol=1e-5), (out2, ref2)

    # 3) Wide class count (>=128) exercises the row-major path with padding.
    N3, C3 = 12, 130
    k5, k6 = jax.random.split(k2)
    pred3 = jax.random.normal(k5, (N3, C3), dtype=jnp.float32)
    labels3 = jax.random.randint(k6, (N3,), 0, C3, dtype=jnp.int32)
    out3 = weighted_symmetric_cross_entropy(
        pred3, labels3, alpha=alpha, beta=beta, num_classes=C3)
    out3 = jax.block_until_ready(out3)
    ref3 = _wsce_ref(pred3, labels3, alpha, beta, C3, None)
    assert jnp.allclose(out3, ref3, atol=1e-5, rtol=1e-5), (out3, ref3)

    print("KERNEL_OK")
</pallas_src>

<mosaic_0001>
module attributes {stable_mosaic.version = 11 : i64} {
  func.func @_wsce_lane_major_kernel(%arg0: i32, %arg1: memref<2x128xf32, #tpu.memory_space<vmem>>, %arg2: memref<1x128xi32, #tpu.memory_space<vmem>>, %arg3: memref<2x1xf32, #tpu.memory_space<vmem>>, %arg4: memref<1x128xf32, #tpu.memory_space<vmem>>) attributes {dimension_semantics = [#tpu.dimension_semantics<parallel>], iteration_bounds = array<i64: 1>, scalar_prefetch = 0 : i64, scratch_operands = 0 : i64, tpu.core_type = #tpu.core_type<tc>, window_params = [{transform_indices = @transform_0, window_bounds = array<i64: 2, 128>}, {transform_indices = @transform_1, window_bounds = array<i64: 1, 128>}, {pipeline_mode = #tpu.pipeline_mode<synchronous>, transform_indices = @transform_2, window_bounds = array<i64: 2, 1>}, {transform_indices = @transform_3, window_bounds = array<i64: 1, 128>}]} {
    %c0 = arith.constant 0 : index
    %c0_0 = arith.constant 0 : index
    %0 = vector.load %arg1[%c0, %c0_0] : memref<2x128xf32, #tpu.memory_space<vmem>>, vector<2x128xf32>
    %c0_1 = arith.constant 0 : index
    %c0_2 = arith.constant 0 : index
    %1 = vector.load %arg2[%c0_1, %c0_2] : memref<1x128xi32, #tpu.memory_space<vmem>>, vector<1x128xi32>
    %c0_3 = arith.constant 0 : index
    %c0_4 = arith.constant 0 : index
    %2 = vector.load %arg3[%c0_3, %c0_4] : memref<2x1xf32, #tpu.memory_space<vmem>>, vector<2x1xf32>
    %cst = arith.constant dense<0xFF800000> : vector<128xf32>
    %3 = vector.multi_reduction <maximumf>, %0, %cst [0] : vector<2x128xf32> to vector<128xf32>
    %4 = vector.shape_cast %3 : vector<128xf32> to vector<1x128xf32>
    %5 = vector.broadcast %4 : vector<1x128xf32> to vector<2x128xf32>
    %6 = arith.subf %0, %5 : vector<2x128xf32>
    %7 = math.exp %6 : vector<2x128xf32>
    %cst_5 = arith.constant dense<0.000000e+00> : vector<128xf32>
    %8 = vector.multi_reduction <add>, %7, %cst_5 [0] : vector<2x128xf32> to vector<128xf32>
    %9 = vector.shape_cast %8 : vector<128xf32> to vector<1x128xf32>
    %10 = vector.broadcast %9 : vector<1x128xf32> to vector<2x128xf32>
    %11 = arith.divf %7, %10 : vector<2x128xf32>
    %cst_6 = arith.constant 1.000000e-07 : f32
    %cst_7 = arith.constant 1.000000e+00 : f32
    %12 = vector.broadcast %cst_6 : f32 to vector<2x128xf32>
    %13 = arith.maximumf %12, %11 : vector<2x128xf32>
    %14 = vector.broadcast %cst_7 : f32 to vector<2x128xf32>
    %15 = arith.minimumf %14, %13 : vector<2x128xf32>
    %16 = tpu.iota {dimensions = array<i32: 0>} : vector<2x128xi32>
    %17 = vector.broadcast %1 : vector<1x128xi32> to vector<2x128xi32>
    %18 = arith.cmpi eq, %16, %17 : vector<2x128xi32>
    %cst_8 = arith.constant 0.000000e+00 : f32
    %19 = vector.broadcast %cst_8 : f32 to vector<2x128xf32>
    %20 = arith.select %18, %15, %19 : vector<2x128xi1>, vector<2x128xf32>
    %cst_9 = arith.constant dense<0.000000e+00> : vector<128xf32>
    %21 = vector.multi_reduction <add>, %20, %cst_9 [0] : vector<2x128xf32> to vector<128xf32>
    %22 = vector.shape_cast %21 : vector<128xf32> to vector<1x128xf32>
    %cst_10 = arith.constant dense<0.000000e+00> : vector<128xf32>
    %23 = vector.multi_reduction <add>, %15, %cst_10 [0] : vector<2x128xf32> to vector<128xf32>
    %24 = vector.shape_cast %23 : vector<128xf32> to vector<1x128xf32>
    %25 = math.log %22 : vector<1x128xf32>
    %cst_11 = arith.constant 0.000000e+00 : f32
    %26 = vector.broadcast %cst_11 : f32 to vector<1x128xf32>
    %27 = arith.subf %26, %25 : vector<1x128xf32>
    %cst_12 = arith.constant 9.9999994E-8 : f32
    %28 = vector.broadcast %cst_12 : f32 to vector<1x128xf32>
    %29 = arith.mulf %22, %28 : vector<1x128xf32>
    %30 = arith.subf %24, %22 : vector<1x128xf32>
    %cst_13 = arith.constant -16.1180954 : f32
    %31 = vector.broadcast %cst_13 : f32 to vector<1x128xf32>
    %32 = arith.mulf %30, %31 : vector<1x128xf32>
    %33 = arith.addf %29, %32 : vector<1x128xf32>
    %cst_14 = arith.constant 0.000000e+00 : f32
    %34 = vector.broadcast %cst_14 : f32 to vector<1x128xf32>
    %35 = arith.subf %34, %33 : vector<1x128xf32>
    %cst_15 = arith.constant 0.000000e+00 : f32
    %36 = vector.shape_cast %2 : vector<2x1xf32> to vector<2x1xf32>
    %37 = vector.broadcast %36 : vector<2x1xf32> to vector<2x128xf32>
    %38 = vector.broadcast %cst_15 : f32 to vector<2x128xf32>
    %39 = arith.select %18, %37, %38 : vector<2x128xi1>, vector<2x128xf32>
    %cst_16 = arith.constant dense<0.000000e+00> : vector<128xf32>
    %40 = vector.multi_reduction <add>, %39, %cst_16 [0] : vector<2x128xf32> to vector<128xf32>
    %41 = vector.shape_cast %40 : vector<128xf32> to vector<1x128xf32>
    %cst_17 = arith.constant 1.000000e-01 : f32
    %42 = vector.broadcast %cst_17 : f32 to vector<1x128xf32>
    %43 = arith.mulf %42, %27 : vector<1x128xf32>
    %cst_18 = arith.constant 1.000000e+00 : f32
    %44 = vector.broadcast %cst_18 : f32 to vector<1x128xf32>
    %45 = arith.mulf %44, %35 : vector<1x128xf32>
    %46 = arith.addf %43, %45 : vector<1x128xf32>
    %47 = arith.mulf %41, %46 : vector<1x128xf32>
    %48 = tpu.iota {dimensions = array<i32: 1>} : vector<1x128xi32>
    %c128_i32 = arith.constant 128 : i32
    %49 = arith.muli %arg0, %c128_i32 : i32
    %50 = vector.broadcast %49 : i32 to vector<1x128xi32>
    %51 = arith.addi %48, %50 : vector<1x128xi32>
    %c16_i32 = arith.constant 16 : i32
    %52 = vector.broadcast %c16_i32 : i32 to vector<1x128xi32>
    %53 = arith.cmpi slt, %51, %52 : vector<1x128xi32>
    %cst_19 = arith.constant 0.000000e+00 : f32
    %54 = vector.broadcast %cst_19 : f32 to vector<1x128xf32>
    %55 = arith.select %53, %47, %54 : vector<1x128xi1>, vector<1x128xf32>
    %c0_20 = arith.constant 0 : index
    %c0_21 = arith.constant 0 : index
    %56 = vector.load %arg4[%c0_20, %c0_21] : memref<1x128xf32, #tpu.memory_space<vmem>>, vector<1x128xf32>
    tpu.vector_store %arg4[%c0_20, %c0_21], %55 {strides = array<i32>} : memref<1x128xf32, #tpu.memory_space<vmem>>, vector<1x128xf32>,
    return
  }
  func.func @transform_0(%arg0: i32) -> (i32, i32) {
    %c0_i32 = arith.constant 0 : i32
    %c0_i32_0 = arith.constant 0 : i32
    return %c0_i32, %arg0 : i32, i32
  }
  func.func @transform_1(%arg0: i32) -> (i32, i32) {
    %c0_i32 = arith.constant 0 : i32
    %c0_i32_0 = arith.constant 0 : i32
    return %c0_i32, %arg0 : i32, i32
  }
  func.func @transform_2(%arg0: i32) -> (i32, i32) {
    %c0_i32 = arith.constant 0 : i32
    %c0_i32_0 = arith.constant 0 : i32
    %c0_i32_1 = arith.constant 0 : i32
    return %c0_i32, %c0_i32_0 : i32, i32
  }
  func.func @transform_3(%arg0: i32) -> (i32, i32) {
    %c0_i32 = arith.constant 0 : i32
    %c0_i32_0 = arith.constant 0 : i32
    return %c0_i32, %arg0 : i32, i32
  }
}

</mosaic_0001>

<bundles_post_ra>
// kernel: tpu_custom_call.1
= control target key start
LH: loop header
LB: loop body
LE: loop exit
PB: predicated region body
PF: predicated region fallthrough
CT: control target
= control target key end

     0   :  { %v156_v1 = vmov 0   ;;  %s197_s0 = inlined_call_operand.vmem [shape: f32[2,128], index: 0, kind: input, shape index: {}]   ;;  %s198_s1 = inlined_call_operand.vmem [shape: s32[1,128], index: 1, kind: input, shape index: {}]   ;;  %s199_s2 = inlined_call_operand.vmem [shape: f32[2,1], index: 2, kind: input, shape index: {}]   ;;  %s200_s3 = inlined_call_operand.hbm [shape: f32[1,128], index: 3, kind: output, shape index: {}]  }
   0x1   :  { %v17_v0 = vld [vmem:[%s199_s2] sm:$0x3]  ;;  %122 = vset.pattern.permute.xlu0 %v156_v1 }
   0x2   :  { %8 = vsyncpa [#allocation3], 0  ;;  %82 = vperm.xlu0 %122, %v17_v0   ;;  %vm18_vm0 = vcmask 1041408   ;;  %v15_v2 = vld [vmem:[%s197_s0] sm:$0x3]  ;;  %v53_v31 = vlaneseq  ;;  %s111_s19 = sshll.u32 %s200_s3, 4  ;;  %s112_s19 = int_to_ptr.hbm [resolvable:$true] %s111_s19 }
   0x3   :  { %v19_v3 = vsel %vm18_vm0, %v15_v2, -inf  ;;  %v123_v34 = vld [vmem:[%s198_s1] ss:$0 sm:$0xff]  ;;  %s157_s1 = smov [#allocation2]  }
   0x4   :  { %v20_v4 = vrot.slane %v19_v3, 4  ;;  %v54_v33 = vshrl.u32 %v53_v31, 7  ;;  %s109_s16 = sshll.u32 %s157_s1, 4  ;;  %s110_s16 = int_to_ptr.vmem [resolvable:$true] %s109_s16 }
   0x6   :  { %v21_v5 = vmax.f32 %v19_v3, %v20_v4  ;;  %vm56_vm5 = vcmp.eq.s32.totalorder %v54_v33, %v123_v34  ;;  %v97_v3 = vand.u32 127, %v53_v31 }
   0x8   :  { %v22_v6 = vrot.slane %v21_v5, 2  ;;  %vm101_vm6 = vcmp.lt.s32.totalorder %v97_v3, 16 }
   0xa   :  { %v23_v7 = vmax.f32 %v21_v5, %v22_v6 }
   0xc   :  { %v24_v8 = vrot.slane %v23_v7, 1 }
   0xe   :  { %v25_v9 = vmax.f32 %v23_v7, %v24_v8 }
  0x10   :  { %v26_v10 = vsub.f32 %v15_v2, %v25_v9 }
  0x12   :  { %v27_v11 = vmul.f32 1.442695, %v26_v10 }
  0x14   :  { %124 = vpow2.f32 %v27_v11 }
  0x1a   :  { %v125_v12 = vpop.eup %124 }
  0x1b   :  { %v29_v13 = vsel %vm18_vm0, %v125_v12, 0.0 }
  0x1c   :  { %v30_v14 = vrot.slane %v29_v13, 4 }
  0x1e   :  { %v31_v15 = vadd.f32 %v30_v14, %v29_v13 }
  0x20   :  { %v32_v16 = vrot.slane %v31_v15, 2 }
  0x22   :  { %v33_v17 = vadd.f32 %v32_v16, %v31_v15 }
  0x24   :  { %v34_v18 = vrot.slane %v33_v17, 1 }
  0x26   :  { %v35_v19 = vadd.f32 %v34_v18, %v33_v17 }
  0x28   :  { %126 = vrcp.f32 %v35_v19  ;;  %v47_v24 = vand.u32 2147483648, %v35_v19  ;;  %vm41_vm1 = vweird.f32 %v35_v19  ;;  %v45_v26 = vand.u32 2147483647, %v35_v19 }
  0x2a   :  { %v48_v27 = vor.u32 1.1754944e-38, %v47_v24  ;;  %vm46_vm4 = vcmp.eq.f32.partialorder %v45_v26, 8.507059e+37 }
  0x2e   :  { %v127_v20 = vpop.eup %126 }
  0x2f   :  { %v37_v21 = vmul.f32 %v127_v20, %v35_v19  ;;  %vm42_vm2 = vweird.f32 %v127_v20 }
  0x30   :  { %vm43_vm3 = vmor %vm41_vm1, %vm42_vm2 }
  0x31   :  { %v38_v22 = vsub.f32 1.0, %v37_v21 }
  0x33   :  { %v39_v23 = vmul.f32 %v127_v20, %v38_v22 }
  0x35   :  { %v40_v25 = vadd.f32 %v127_v20, %v39_v23 }
  0x37   :  { %v44_v28 = vsel %vm43_vm3, %v127_v20, %v40_v25 }
  0x38   :  { %v49_v29 = vsel %vm46_vm4, %v48_v27, %v44_v28 }
  0x39   :  { %v50_v30 = vmul.f32 %v125_v12, %v49_v29 }
  0x3b   :  { %v51_v32 = vmax.f32 %v50_v30, 1e-07 }
  0x3d   :  { %v52_v35 = vmin.f32 %v51_v32, 1.0 }
  0x3f   :  { %v57_v36 = vsel %vm56_vm5, %v52_v35, 0.0  ;;  %v65_v39 = vsel %vm18_vm0, %v52_v35, 0.0 }
  0x40   :  { %v58_v37 = vsel %vm18_vm0, %v57_v36, 0.0  ;;  %v66_v41 = vrot.slane %v65_v39, 4 }
  0x41   :  { %v59_v38 = vrot.slane %v58_v37, 4 }
  0x42   :  { %v67_v43 = vadd.f32 %v66_v41, %v65_v39 }
  0x43   :  { %v60_v40 = vadd.f32 %v59_v38, %v58_v37 }
  0x44   :  { %v68_v45 = vrot.slane %v67_v43, 2 }
  0x45   :  { %v61_v42 = vrot.slane %v60_v40, 2 }
  0x46   :  { %v69_v47 = vadd.f32 %v68_v45, %v67_v43 }
  0x47   :  { %v62_v44 = vadd.f32 %v61_v42, %v60_v40 }
  0x48   :  { %v70_v49 = vrot.slane %v69_v47, 1 }
  0x49   :  { %v63_v46 = vrot.slane %v62_v44, 1 }
  0x4a   :  { %v71_v50 = vadd.f32 %v70_v49, %v69_v47 }
  0x4b   :  { %v64_v48 = vadd.f32 %v63_v46, %v62_v44 }
  0x4d   :  { %128 = vlog2.f32 %v64_v48  ;;  %v76_v51 = vsub.f32 %v71_v50, %v64_v48  ;;  %v75_v54 = vmul.f32 9.9999994e-08, %v64_v48 }
  0x4f   :  { %v77_v55 = vmul.f32 -16.118095, %v76_v51 }
  0x51   :  { %v78_v61 = vadd.f32 %v77_v55, %v75_v54 }
  0x53   :  { %v129_v52 = vpop.eup %128  ;;  %v79_v0 = vsub.f32 0.0, %v78_v61 }
  0x54   :  { %v73_v53 = vmul.f32 0.6931472, %v129_v52 }
  0x56   :  { %v74_v60 = vsub.f32 0.0, %v73_v53 }
  0x58   :  { %v93_v1 = vmul.f32 0.1, %v74_v60 }
  0x5a   :  { %v94_v5 = vadd.f32 %v93_v1, %v79_v0 }
  0x74   :  { %v83_v56 = vpop.permute.xlu0 %82 }
  0x75   :  { %v85_v57 = vsel %vm56_vm5, %v83_v56, 0.0 }
  0x76   :  { %v86_v58 = vsel %vm18_vm0, %v85_v57, 0.0 }
  0x77   :  { %v87_v59 = vrot.slane %v86_v58, 4 }
  0x79   :  { %v88_v62 = vadd.f32 %v87_v59, %v86_v58 }
  0x7b   :  { %v89_v63 = vrot.slane %v88_v62, 2 }
  0x7d   :  { %v90_v2 = vadd.f32 %v89_v63, %v88_v62 }
  0x7f   :  { %v91_v4 = vrot.slane %v90_v2, 1 }
  0x81   :  { %v92_v6 = vadd.f32 %v91_v4, %v90_v2 }
  0x83   :  { %v95_v7 = vmul.f32 %v94_v5, %v92_v6 }
  0x85   :  { %v102_v8 = vsel %vm101_vm6, %v95_v7, 0.0 }
  0x86   :  { %103 = vst [vmem:[#allocation2] sm:$0x1] %v102_v8 }
  0x87   :  { %114 = dma.vmem_to_hbm [thread:$0]  %s110_s16, 16, %s112_s19, [#allocation3]  }
  0x88   :  { %154 = dma.done.wait [#allocation3], 16  }
  0x89   :  { %155 = vsyncadd [#allocation3], 4294967280 }
  0x8a   :  { %119 = vsyncpa [#allocation3], 1 }

</bundles_post_ra>
